<compile_context>
chip_gen: v7x
topology: tpu7x:2x2x1
jax: 0.10.0
libtpu: 0.0.40
codegen_flags: <defaults>
</compile_context>

<pallas_src>
import functools

import jax
import jax.numpy as jnp
from jax.experimental import pallas as pl
from jax.experimental.pallas import tpu as pltpu


# ~4 MiB of (x + out) moved per grid step; the Pallas pipeline double-buffers
# this -> ~8 MiB VMEM, inside v5e's 16 MiB default scoped VMEM (v6e/v7x: 32).
_TARGET_STEP_BYTES = 4 * 1024 * 1024


def _cdiv(a, b):
    return -(-a // b)


def _round_down_mult(x, m):
    return (x // m) * m


def _outconv_vpu_kernel(w_ref, b_ref, x_ref, o_ref):
    """Small-channel path: unrolled VPU FMAs over dense (TR, 128) slabs.

    w_ref: SMEM (C_out, C_in) f32     b_ref: SMEM (C_out,) f32
    x_ref: VMEM (B_blk, C_in, TR, 128)
    o_ref: VMEM (B_blk, C_out, TR, 128)
    """
    b_blk, c_in, tr, lanes = x_ref.shape
    c_out = o_ref.shape[1]
    for b in range(b_blk):                       # static unroll, b_blk small
        # Only C_out accumulator slabs stay live; bias folded into the init.
        accs = [jnp.full((tr, lanes), b_ref[co], jnp.float32)
                for co in range(c_out)]
        for ci in range(c_in):                   # ci outer: lazy slab load
            xs = x_ref[b, ci].astype(jnp.float32)      # dense (TR, 128) slab
            for co in range(c_out):              # co inner: FMA into each acc
                accs[co] = accs[co] + xs * w_ref[co, ci]
        for co in range(c_out):                  # dense multi-sublane stores
            o_ref[b, co] = accs[co].astype(o_ref.dtype)


def _outconv_mxu_kernel(w_ref, b_ref, x_ref, o_ref):
    """Large-channel path: (C_out, C_in) @ (C_in, TP) on the MXU.

    w_ref: VMEM (C_out, C_in)  b_ref: VMEM (C_out, 1)
    x_ref: VMEM (C_in, TP)     o_ref: VMEM (C_out, TP)
    """
    acc = jnp.dot(w_ref[...], x_ref[...], preferred_element_type=jnp.float32)
    o_ref[...] = (acc + b_ref[...]).astype(o_ref.dtype)


def _vpu_mxu_threshold():
    """c_in*c_out crossover below which the unrolled-VPU path beats the MXU.

    Roughly 64 on v7x (3.2 TB/s HBM), 128 on v6e, higher on v5e.  Best-effort
    device sniff with a safe default.
    """
    try:
        kind = jax.devices()[0].device_kind.lower()
    except Exception:
        return 128
    if "v7" in kind:
        return 64
    if "v5" in kind:
        return 256
    return 128


def _choose_vpu_tiles(n, c_in, c_out, r):
    """Pick (b_blk, tr): images and pixel-rows (of 128 lanes) per grid step."""
    bytes_per_row = (c_in + c_out) * 128 * 4          # f32 x + out, 1 image
    rows_fit = max(8, _round_down_mult(_TARGET_STEP_BYTES // bytes_per_row, 8))
    if rows_fit >= r:
        tr = r                                         # whole image per step
    else:
        tr = rows_fit                                  # multiple of 8 rows
    b_blk = 1
    if tr == r:
        # Small images: fold several images into one grid step so each step
        # still moves MBs (amortizes the ~0.35 us per-step overhead).
        per_image = r * bytes_per_row
        while (b_blk * 2 <= n and n % (b_blk * 2) == 0
               and b_blk * 2 * per_image <= _TARGET_STEP_BYTES):
            b_blk *= 2
    # Keep >=2 grid steps when cheap so v7x's two TensorCores both get work.
    if (n // b_blk) * _cdiv(r, tr) < 2 and r >= 16:
        tr = max(8, _round_down_mult(_cdiv(r, 2) + 7, 8))
    return b_blk, tr


@jax.jit
def outconv_forward(x, weight, bias):
    """1x1 Conv2d forward (PyTorch nn.Conv2d(in, out, kernel_size=1) semantics).

    x:      (N, C_in, H, W)   NCHW
    weight: (C_out, C_in, 1, 1)
    bias:   (C_out,)
    returns (N, C_out, H, W), dtype of x.
    """
    n, c_in, h, w_sp = x.shape
    c_out = weight.shape[0]
    hw = h * w_sp
    hw_pad = _cdiv(hw, 128) * 128

    # Free reshape to (N, C_in, H*W); pad the pixel axis to a multiple of 128
    # only if needed so all blocks are lane-dense (no masked partial stores).
    x3 = x.reshape(n, c_in, hw)
    if hw_pad != hw:
        x3 = jnp.pad(x3, ((0, 0), (0, 0), (0, hw_pad - hw)))
    w2 = weight.reshape(c_out, c_in).astype(jnp.float32)
    b1 = bias.astype(jnp.float32)

    use_vpu = (c_in * c_out) <= _vpu_mxu_threshold()

    if use_vpu:
        r = hw_pad // 128
        b_blk, tr = _choose_vpu_tiles(n, c_in, c_out, r)
        x4 = x3.reshape(n, c_in, r, 128)               # free reshape
        grid = (n // b_blk, _cdiv(r, tr))              # ragged last row block OK
        y4 = pl.pallas_call(
            _outconv_vpu_kernel,
            out_shape=jax.ShapeDtypeStruct((n, c_out, r, 128), x.dtype),
            grid_spec=pltpu.PrefetchScalarGridSpec(
                num_scalar_prefetch=0,
                grid=grid,
                in_specs=[
                    pl.BlockSpec(memory_space=pltpu.MemorySpace.SMEM),  # weights
                    pl.BlockSpec(memory_space=pltpu.MemorySpace.SMEM),  # bias
                    pl.BlockSpec((b_blk, c_in, tr, 128),
                                 lambda bi, pi: (bi, 0, pi, 0)),
                ],
                out_specs=pl.BlockSpec((b_blk, c_out, tr, 128),
                                       lambda bi, pi: (bi, 0, pi, 0)),
            ),
            compiler_params=pltpu.CompilerParams(
                dimension_semantics=("parallel", "parallel")),
        )(w2, b1, x4)
        y3 = y4.reshape(n, c_out, hw_pad)
    else:
        tp = _round_down_mult(
            max(128, _TARGET_STEP_BYTES // ((c_in + c_out) * 4)), 128)
        tp = min(tp, hw_pad)
        grid = (n, _cdiv(hw_pad, tp))                  # ragged last pixel block OK
        y3 = pl.pallas_call(
            _outconv_mxu_kernel,
            out_shape=jax.ShapeDtypeStruct((n, c_out, hw_pad), x.dtype),
            grid_spec=pltpu.PrefetchScalarGridSpec(
                num_scalar_prefetch=0,
                grid=grid,
                in_specs=[
                    pl.BlockSpec((c_out, c_in), lambda bi, pi: (0, 0)),  # pinned
                    pl.BlockSpec((c_out, 1), lambda bi, pi: (0, 0)),     # pinned
                    pl.BlockSpec((None, c_in, tp), lambda bi, pi: (bi, 0, pi)),
                ],
                out_specs=pl.BlockSpec((None, c_out, tp),
                                       lambda bi, pi: (bi, 0, pi)),
            ),
            compiler_params=pltpu.CompilerParams(
                dimension_semantics=("parallel", "parallel")),
        )(w2, b1.reshape(c_out, 1), x3)

    if hw_pad != hw:
        y3 = y3[:, :, :hw]
    return y3.reshape(n, c_out, h, w_sp)


def init_outconv_params(key, in_channels, out_channels, dtype=jnp.float32):
    """Deterministic init matching nn.Conv2d(in, out, kernel_size=1) shapes."""
    k_w, k_b = jax.random.split(key)
    fan_in = in_channels * 1 * 1
    bound = 1.0 / (fan_in ** 0.5)
    weight = jax.random.uniform(
        k_w, (out_channels, in_channels, 1, 1), dtype, minval=-bound, maxval=bound)
    bias = jax.random.uniform(
        k_b, (out_channels,), dtype, minval=-bound, maxval=bound)
    return weight, bias


if __name__ == "__main__":
    key = jax.random.PRNGKey(0)
    k_x, k_p = jax.random.split(key)

    N, C_IN, C_OUT, H, W = 2, 4, 3, 16, 16
    x = jax.random.normal(k_x, (N, C_IN, H, W), dtype=jnp.float32)
    weight, bias = init_outconv_params(k_p, C_IN, C_OUT)

    y = outconv_forward(x, weight, bias)
    y = jax.block_until_ready(y)

    # Pure-JAX reference (same math as nn.Conv2d with kernel_size=1).
    y_ref = jnp.einsum("nchw,oc->nohw", x, weight.reshape(C_OUT, C_IN)) \
            + bias.reshape(1, C_OUT, 1, 1)

    assert y.shape == (N, C_OUT, H, W)
    assert jnp.allclose(y, y_ref, atol=1e-5, rtol=1e-5)
    print("KERNEL_OK")
</pallas_src>

<mosaic_0001>
module attributes {stable_mosaic.version = 11 : i64} {
  func.func @_outconv_vpu_kernel(%arg0: i32, %arg1: i32, %arg2: memref<3x4xf32, #tpu.memory_space<smem>>, %arg3: memref<3xf32, #tpu.memory_space<smem>>, %arg4: memref<2x4x2x128xf32, #tpu.memory_space<vmem>>, %arg5: memref<2x3x2x128xf32, #tpu.memory_space<vmem>>) attributes {dimension_semantics = [#tpu.dimension_semantics<parallel>, #tpu.dimension_semantics<parallel>], iteration_bounds = array<i64: 1, 1>, scalar_prefetch = 0 : i64, scratch_operands = 0 : i64, tpu.core_type = #tpu.core_type<tc>, window_params = [{transform_indices = @transform_0, window_bounds = array<i64: 3, 4>}, {transform_indices = @transform_1, window_bounds = array<i64: 3>}, {transform_indices = @transform_2, window_bounds = array<i64: 2, 4, 2, 128>}, {transform_indices = @transform_3, window_bounds = array<i64: 2, 3, 2, 128>}]} {
    %c0 = arith.constant 0 : index
    %0 = memref.load %arg3[%c0] : memref<3xf32, #tpu.memory_space<smem>>
    %1 = vector.broadcast %0 : f32 to vector<2x128xf32>
    %c1 = arith.constant 1 : index
    %2 = memref.load %arg3[%c1] : memref<3xf32, #tpu.memory_space<smem>>
    %3 = vector.broadcast %2 : f32 to vector<2x128xf32>
    %c2 = arith.constant 2 : index
    %4 = memref.load %arg3[%c2] : memref<3xf32, #tpu.memory_space<smem>>
    %5 = vector.broadcast %4 : f32 to vector<2x128xf32>
    %c0_0 = arith.constant 0 : index
    %c0_1 = arith.constant 0 : index
    %c0_2 = arith.constant 0 : index
    %c0_3 = arith.constant 0 : index
    %6 = vector.load %arg4[%c0_0, %c0_1, %c0_2, %c0_3] : memref<2x4x2x128xf32, #tpu.memory_space<vmem>>, vector<1x1x2x128xf32>
    %7 = vector.shape_cast %6 : vector<1x1x2x128xf32> to vector<2x128xf32>
    %c0_4 = arith.constant 0 : index
    %c0_5 = arith.constant 0 : index
    %8 = memref.load %arg2[%c0_4, %c0_5] : memref<3x4xf32, #tpu.memory_space<smem>>
    %9 = vector.broadcast %8 : f32 to vector<2x128xf32>
    %10 = arith.mulf %7, %9 : vector<2x128xf32>
    %11 = arith.addf %1, %10 : vector<2x128xf32>
    %c1_6 = arith.constant 1 : index
    %c0_7 = arith.constant 0 : index
    %12 = memref.load %arg2[%c1_6, %c0_7] : memref<3x4xf32, #tpu.memory_space<smem>>
    %13 = vector.broadcast %12 : f32 to vector<2x128xf32>
    %14 = arith.mulf %7, %13 : vector<2x128xf32>
    %15 = arith.addf %3, %14 : vector<2x128xf32>
    %c2_8 = arith.constant 2 : index
    %c0_9 = arith.constant 0 : index
    %16 = memref.load %arg2[%c2_8, %c0_9] : memref<3x4xf32, #tpu.memory_space<smem>>
    %17 = vector.broadcast %16 : f32 to vector<2x128xf32>
    %18 = arith.mulf %7, %17 : vector<2x128xf32>
    %19 = arith.addf %5, %18 : vector<2x128xf32>
    %c0_10 = arith.constant 0 : index
    %c1_11 = arith.constant 1 : index
    %c0_12 = arith.constant 0 : index
    %c0_13 = arith.constant 0 : index
    %20 = vector.load %arg4[%c0_10, %c1_11, %c0_12, %c0_13] : memref<2x4x2x128xf32, #tpu.memory_space<vmem>>, vector<1x1x2x128xf32>
    %21 = vector.shape_cast %20 : vector<1x1x2x128xf32> to vector<2x128xf32>
    %c0_14 = arith.constant 0 : index
    %c1_15 = arith.constant 1 : index
    %22 = memref.load %arg2[%c0_14, %c1_15] : memref<3x4xf32, #tpu.memory_space<smem>>
    %23 = vector.broadcast %22 : f32 to vector<2x128xf32>
    %24 = arith.mulf %21, %23 : vector<2x128xf32>
    %25 = arith.addf %11, %24 : vector<2x128xf32>
    %c1_16 = arith.constant 1 : index
    %c1_17 = arith.constant 1 : index
    %26 = memref.load %arg2[%c1_16, %c1_17] : memref<3x4xf32, #tpu.memory_space<smem>>
    %27 = vector.broadcast %26 : f32 to vector<2x128xf32>
    %28 = arith.mulf %21, %27 : vector<2x128xf32>
    %29 = arith.addf %15, %28 : vector<2x128xf32>
    %c2_18 = arith.constant 2 : index
    %c1_19 = arith.constant 1 : index
    %30 = memref.load %arg2[%c2_18, %c1_19] : memref<3x4xf32, #tpu.memory_space<smem>>
    %31 = vector.broadcast %30 : f32 to vector<2x128xf32>
    %32 = arith.mulf %21, %31 : vector<2x128xf32>
    %33 = arith.addf %19, %32 : vector<2x128xf32>
    %c0_20 = arith.constant 0 : index
    %c2_21 = arith.constant 2 : index
    %c0_22 = arith.constant 0 : index
    %c0_23 = arith.constant 0 : index
    %34 = vector.load %arg4[%c0_20, %c2_21, %c0_22, %c0_23] : memref<2x4x2x128xf32, #tpu.memory_space<vmem>>, vector<1x1x2x128xf32>
    %35 = vector.shape_cast %34 : vector<1x1x2x128xf32> to vector<2x128xf32>
    %c0_24 = arith.constant 0 : index
    %c2_25 = arith.constant 2 : index
    %36 = memref.load %arg2[%c0_24, %c2_25] : memref<3x4xf32, #tpu.memory_space<smem>>
    %37 = vector.broadcast %36 : f32 to vector<2x128xf32>
    %38 = arith.mulf %35, %37 : vector<2x128xf32>
    %39 = arith.addf %25, %38 : vector<2x128xf32>
    %c1_26 = arith.constant 1 : index
    %c2_27 = arith.constant 2 : index
    %40 = memref.load %arg2[%c1_26, %c2_27] : memref<3x4xf32, #tpu.memory_space<smem>>
    %41 = vector.broadcast %40 : f32 to vector<2x128xf32>
    %42 = arith.mulf %35, %41 : vector<2x128xf32>
    %43 = arith.addf %29, %42 : vector<2x128xf32>
    %c2_28 = arith.constant 2 : index
    %c2_29 = arith.constant 2 : index
    %44 = memref.load %arg2[%c2_28, %c2_29] : memref<3x4xf32, #tpu.memory_space<smem>>
    %45 = vector.broadcast %44 : f32 to vector<2x128xf32>
    %46 = arith.mulf %35, %45 : vector<2x128xf32>
    %47 = arith.addf %33, %46 : vector<2x128xf32>
    %c0_30 = arith.constant 0 : index
    %c3 = arith.constant 3 : index
    %c0_31 = arith.constant 0 : index
    %c0_32 = arith.constant 0 : index
    %48 = vector.load %arg4[%c0_30, %c3, %c0_31, %c0_32] : memref<2x4x2x128xf32, #tpu.memory_space<vmem>>, vector<1x1x2x128xf32>
    %49 = vector.shape_cast %48 : vector<1x1x2x128xf32> to vector<2x128xf32>
    %c0_33 = arith.constant 0 : index
    %c3_34 = arith.constant 3 : index
    %50 = memref.load %arg2[%c0_33, %c3_34] : memref<3x4xf32, #tpu.memory_space<smem>>
    %51 = vector.broadcast %50 : f32 to vector<2x128xf32>
    %52 = arith.mulf %49, %51 : vector<2x128xf32>
    %53 = arith.addf %39, %52 : vector<2x128xf32>
    %c1_35 = arith.constant 1 : index
    %c3_36 = arith.constant 3 : index
    %54 = memref.load %arg2[%c1_35, %c3_36] : memref<3x4xf32, #tpu.memory_space<smem>>
    %55 = vector.broadcast %54 : f32 to vector<2x128xf32>
    %56 = arith.mulf %49, %55 : vector<2x128xf32>
    %57 = arith.addf %43, %56 : vector<2x128xf32>
    %c2_37 = arith.constant 2 : index
    %c3_38 = arith.constant 3 : index
    %58 = memref.load %arg2[%c2_37, %c3_38] : memref<3x4xf32, #tpu.memory_space<smem>>
    %59 = vector.broadcast %58 : f32 to vector<2x128xf32>
    %60 = arith.mulf %49, %59 : vector<2x128xf32>
    %61 = arith.addf %47, %60 : vector<2x128xf32>
    %c0_39 = arith.constant 0 : index
    %c0_40 = arith.constant 0 : index
    %c0_41 = arith.constant 0 : index
    %c0_42 = arith.constant 0 : index
    %62 = vector.load %arg5[%c0_39, %c0_40, %c0_41, %c0_42] : memref<2x3x2x128xf32, #tpu.memory_space<vmem>>, vector<1x1x2x128xf32>
    %63 = vector.shape_cast %62 : vector<1x1x2x128xf32> to vector<2x128xf32>
    %64 = vector.shape_cast %53 : vector<2x128xf32> to vector<1x1x2x128xf32>
    tpu.vector_store %arg5[%c0_39, %c0_40, %c0_41, %c0_42], %64 {strides = array<i32>} : memref<2x3x2x128xf32, #tpu.memory_space<vmem>>, vector<1x1x2x128xf32>,
    %c0_43 = arith.constant 0 : index
    %c1_44 = arith.constant 1 : index
    %c0_45 = arith.constant 0 : index
    %c0_46 = arith.constant 0 : index
    %65 = vector.load %arg5[%c0_43, %c1_44, %c0_45, %c0_46] : memref<2x3x2x128xf32, #tpu.memory_space<vmem>>, vector<1x1x2x128xf32>
    %66 = vector.shape_cast %65 : vector<1x1x2x128xf32> to vector<2x128xf32>
    %67 = vector.shape_cast %57 : vector<2x128xf32> to vector<1x1x2x128xf32>
    tpu.vector_store %arg5[%c0_43, %c1_44, %c0_45, %c0_46], %67 {strides = array<i32>} : memref<2x3x2x128xf32, #tpu.memory_space<vmem>>, vector<1x1x2x128xf32>,
    %c0_47 = arith.constant 0 : index
    %c2_48 = arith.constant 2 : index
    %c0_49 = arith.constant 0 : index
    %c0_50 = arith.constant 0 : index
    %68 = vector.load %arg5[%c0_47, %c2_48, %c0_49, %c0_50] : memref<2x3x2x128xf32, #tpu.memory_space<vmem>>, vector<1x1x2x128xf32>
    %69 = vector.shape_cast %68 : vector<1x1x2x128xf32> to vector<2x128xf32>
    %70 = vector.shape_cast %61 : vector<2x128xf32> to vector<1x1x2x128xf32>
    tpu.vector_store %arg5[%c0_47, %c2_48, %c0_49, %c0_50], %70 {strides = array<i32>} : memref<2x3x2x128xf32, #tpu.memory_space<vmem>>, vector<1x1x2x128xf32>,
    %c0_51 = arith.constant 0 : index
    %71 = memref.load %arg3[%c0_51] : memref<3xf32, #tpu.memory_space<smem>>
    %72 = vector.broadcast %71 : f32 to vector<2x128xf32>
    %c1_52 = arith.constant 1 : index
    %73 = memref.load %arg3[%c1_52] : memref<3xf32, #tpu.memory_space<smem>>
    %74 = vector.broadcast %73 : f32 to vector<2x128xf32>
    %c2_53 = arith.constant 2 : index
    %75 = memref.load %arg3[%c2_53] : memref<3xf32, #tpu.memory_space<smem>>
    %76 = vector.broadcast %75 : f32 to vector<2x128xf32>
    %c1_54 = arith.constant 1 : index
    %c0_55 = arith.constant 0 : index
    %c0_56 = arith.constant 0 : index
    %c0_57 = arith.constant 0 : index
    %77 = vector.load %arg4[%c1_54, %c0_55, %c0_56, %c0_57] : memref<2x4x2x128xf32, #tpu.memory_space<vmem>>, vector<1x1x2x128xf32>
    %78 = vector.shape_cast %77 : vector<1x1x2x128xf32> to vector<2x128xf32>
    %c0_58 = arith.constant 0 : index
    %c0_59 = arith.constant 0 : index
    %79 = memref.load %arg2[%c0_58, %c0_59] : memref<3x4xf32, #tpu.memory_space<smem>>
    %80 = vector.broadcast %79 : f32 to vector<2x128xf32>
    %81 = arith.mulf %78, %80 : vector<2x128xf32>
    %82 = arith.addf %72, %81 : vector<2x128xf32>
    %c1_60 = arith.constant 1 : index
    %c0_61 = arith.constant 0 : index
    %83 = memref.load %arg2[%c1_60, %c0_61] : memref<3x4xf32, #tpu.memory_space<smem>>
    %84 = vector.broadcast %83 : f32 to vector<2x128xf32>
    %85 = arith.mulf %78, %84 : vector<2x128xf32>
    %86 = arith.addf %74, %85 : vector<2x128xf32>
    %c2_62 = arith.constant 2 : index
    %c0_63 = arith.constant 0 : index
    %87 = memref.load %arg2[%c2_62, %c0_63] : memref<3x4xf32, #tpu.memory_space<smem>>
    %88 = vector.broadcast %87 : f32 to vector<2x128xf32>
    %89 = arith.mulf %78, %88 : vector<2x128xf32>
    %90 = arith.addf %76, %89 : vector<2x128xf32>
    %c1_64 = arith.constant 1 : index
    %c1_65 = arith.constant 1 : index
    %c0_66 = arith.constant 0 : index
    %c0_67 = arith.constant 0 : index
    %91 = vector.load %arg4[%c1_64, %c1_65, %c0_66, %c0_67] : memref<2x4x2x128xf32, #tpu.memory_space<vmem>>, vector<1x1x2x128xf32>
    %92 = vector.shape_cast %91 : vector<1x1x2x128xf32> to vector<2x128xf32>
    %c0_68 = arith.constant 0 : index
    %c1_69 = arith.constant 1 : index
    %93 = memref.load %arg2[%c0_68, %c1_69] : memref<3x4xf32, #tpu.memory_space<smem>>
    %94 = vector.broadcast %93 : f32 to vector<2x128xf32>
    %95 = arith.mulf %92, %94 : vector<2x128xf32>
    %96 = arith.addf %82, %95 : vector<2x128xf32>
    %c1_70 = arith.constant 1 : index
    %c1_71 = arith.constant 1 : index
    %97 = memref.load %arg2[%c1_70, %c1_71] : memref<3x4xf32, #tpu.memory_space<smem>>
    %98 = vector.broadcast %97 : f32 to vector<2x128xf32>
    %99 = arith.mulf %92, %98 : vector<2x128xf32>
    %100 = arith.addf %86, %99 : vector<2x128xf32>
    %c2_72 = arith.constant 2 : index
    %c1_73 = arith.constant 1 : index
    %101 = memref.load %arg2[%c2_72, %c1_73] : memref<3x4xf32, #tpu.memory_space<smem>>
    %102 = vector.broadcast %101 : f32 to vector<2x128xf32>
    %103 = arith.mulf %92, %102 : vector<2x128xf32>
    %104 = arith.addf %90, %103 : vector<2x128xf32>
    %c1_74 = arith.constant 1 : index
    %c2_75 = arith.constant 2 : index
    %c0_76 = arith.constant 0 : index
    %c0_77 = arith.constant 0 : index
    %105 = vector.load %arg4[%c1_74, %c2_75, %c0_76, %c0_77] : memref<2x4x2x128xf32, #tpu.memory_space<vmem>>, vector<1x1x2x128xf32>
    %106 = vector.shape_cast %105 : vector<1x1x2x128xf32> to vector<2x128xf32>
    %c0_78 = arith.constant 0 : index
    %c2_79 = arith.constant 2 : index
    %107 = memref.load %arg2[%c0_78, %c2_79] : memref<3x4xf32, #tpu.memory_space<smem>>
    %108 = vector.broadcast %107 : f32 to vector<2x128xf32>
    %109 = arith.mulf %106, %108 : vector<2x128xf32>
    %110 = arith.addf %96, %109 : vector<2x128xf32>
    %c1_80 = arith.constant 1 : index
    %c2_81 = arith.constant 2 : index
    %111 = memref.load %arg2[%c1_80, %c2_81] : memref<3x4xf32, #tpu.memory_space<smem>>
    %112 = vector.broadcast %111 : f32 to vector<2x128xf32>
    %113 = arith.mulf %106, %112 : vector<2x128xf32>
    %114 = arith.addf %100, %113 : vector<2x128xf32>
    %c2_82 = arith.constant 2 : index
    %c2_83 = arith.constant 2 : index
    %115 = memref.load %arg2[%c2_82, %c2_83] : memref<3x4xf32, #tpu.memory_space<smem>>
    %116 = vector.broadcast %115 : f32 to vector<2x128xf32>
    %117 = arith.mulf %106, %116 : vector<2x128xf32>
    %118 = arith.addf %104, %117 : vector<2x128xf32>
    %c1_84 = arith.constant 1 : index
    %c3_85 = arith.constant 3 : index
    %c0_86 = arith.constant 0 : index
    %c0_87 = arith.constant 0 : index
    %119 = vector.load %arg4[%c1_84, %c3_85, %c0_86, %c0_87] : memref<2x4x2x128xf32, #tpu.memory_space<vmem>>, vector<1x1x2x128xf32>
    %120 = vector.shape_cast %119 : vector<1x1x2x128xf32> to vector<2x128xf32>
    %c0_88 = arith.constant 0 : index
    %c3_89 = arith.constant 3 : index
    %121 = memref.load %arg2[%c0_88, %c3_89] : memref<3x4xf32, #tpu.memory_space<smem>>
    %122 = vector.broadcast %121 : f32 to vector<2x128xf32>
    %123 = arith.mulf %120, %122 : vector<2x128xf32>
    %124 = arith.addf %110, %123 : vector<2x128xf32>
    %c1_90 = arith.constant 1 : index
    %c3_91 = arith.constant 3 : index
    %125 = memref.load %arg2[%c1_90, %c3_91] : memref<3x4xf32, #tpu.memory_space<smem>>
    %126 = vector.broadcast %125 : f32 to vector<2x128xf32>
    %127 = arith.mulf %120, %126 : vector<2x128xf32>
    %128 = arith.addf %114, %127 : vector<2x128xf32>
    %c2_92 = arith.constant 2 : index
    %c3_93 = arith.constant 3 : index
    %129 = memref.load %arg2[%c2_92, %c3_93] : memref<3x4xf32, #tpu.memory_space<smem>>
    %130 = vector.broadcast %129 : f32 to vector<2x128xf32>
    %131 = arith.mulf %120, %130 : vector<2x128xf32>
    %132 = arith.addf %118, %131 : vector<2x128xf32>
    %c1_94 = arith.constant 1 : index
    %c0_95 = arith.constant 0 : index
    %c0_96 = arith.constant 0 : index
    %c0_97 = arith.constant 0 : index
    %133 = vector.load %arg5[%c1_94, %c0_95, %c0_96, %c0_97] : memref<2x3x2x128xf32, #tpu.memory_space<vmem>>, vector<1x1x2x128xf32>
    %134 = vector.shape_cast %133 : vector<1x1x2x128xf32> to vector<2x128xf32>
    %135 = vector.shape_cast %124 : vector<2x128xf32> to vector<1x1x2x128xf32>
    tpu.vector_store %arg5[%c1_94, %c0_95, %c0_96, %c0_97], %135 {strides = array<i32>} : memref<2x3x2x128xf32, #tpu.memory_space<vmem>>, vector<1x1x2x128xf32>,
    %c1_98 = arith.constant 1 : index
    %c1_99 = arith.constant 1 : index
    %c0_100 = arith.constant 0 : index
    %c0_101 = arith.constant 0 : index
    %136 = vector.load %arg5[%c1_98, %c1_99, %c0_100, %c0_101] : memref<2x3x2x128xf32, #tpu.memory_space<vmem>>, vector<1x1x2x128xf32>
    %137 = vector.shape_cast %136 : vector<1x1x2x128xf32> to vector<2x128xf32>
    %138 = vector.shape_cast %128 : vector<2x128xf32> to vector<1x1x2x128xf32>
    tpu.vector_store %arg5[%c1_98, %c1_99, %c0_100, %c0_101], %138 {strides = array<i32>} : memref<2x3x2x128xf32, #tpu.memory_space<vmem>>, vector<1x1x2x128xf32>,
    %c1_102 = arith.constant 1 : index
    %c2_103 = arith.constant 2 : index
    %c0_104 = arith.constant 0 : index
    %c0_105 = arith.constant 0 : index
    %139 = vector.load %arg5[%c1_102, %c2_103, %c0_104, %c0_105] : memref<2x3x2x128xf32, #tpu.memory_space<vmem>>, vector<1x1x2x128xf32>
    %140 = vector.shape_cast %139 : vector<1x1x2x128xf32> to vector<2x128xf32>
    %141 = vector.shape_cast %132 : vector<2x128xf32> to vector<1x1x2x128xf32>
    tpu.vector_store %arg5[%c1_102, %c2_103, %c0_104, %c0_105], %141 {strides = array<i32>} : memref<2x3x2x128xf32, #tpu.memory_space<vmem>>, vector<1x1x2x128xf32>,
    return
  }
  func.func @transform_0(%arg0: i32, %arg1: i32) -> (i32, i32) {
    %c0_i32 = arith.constant 0 : i32
    %c0_i32_0 = arith.constant 0 : i32
    %c0_i32_1 = arith.constant 0 : i32
    return %c0_i32, %c0_i32_0 : i32, i32
  }
  func.func @transform_1(%arg0: i32, %arg1: i32) -> i32 {
    %c0_i32 = arith.constant 0 : i32
    %c0_i32_0 = arith.constant 0 : i32
    return %c0_i32 : i32
  }
  func.func @transform_2(%arg0: i32, %arg1: i32) -> (i32, i32, i32, i32) {
    %c0_i32 = arith.constant 0 : i32
    %c0_i32_0 = arith.constant 0 : i32
    %c0_i32_1 = arith.constant 0 : i32
    return %arg0, %c0_i32, %arg1, %c0_i32_0 : i32, i32, i32, i32
  }
  func.func @transform_3(%arg0: i32, %arg1: i32) -> (i32, i32, i32, i32) {
    %c0_i32 = arith.constant 0 : i32
    %c0_i32_0 = arith.constant 0 : i32
    %c0_i32_1 = arith.constant 0 : i32
    return %arg0, %c0_i32, %arg1, %c0_i32_0 : i32, i32, i32, i32
  }
}

</mosaic_0001>

<bundles_post_ra>
// kernel: outconv_forward.1
= control target key start
LH: loop header
LB: loop body
LE: loop exit
PB: predicated region body
PF: predicated region fallthrough
CT: control target
= control target key end

     0   :  { %8 = vsyncpa [#allocation3], 0  ;;  %s356_s0 = inlined_call_operand.vmem [shape: f32[3,4], index: 0, kind: input, shape index: {}]   ;;  %s357_s1 = inlined_call_operand.vmem [shape: f32[3], index: 1, kind: input, shape index: {}]   ;;  %s358_s2 = inlined_call_operand.vmem [shape: f32[2,4,2,128], index: 2, kind: input, shape index: {}]   ;;  %s359_s3 = inlined_call_operand.vmem [shape: f32[2,3,2,128], index: 3, kind: output, shape index: {}]  }
   0x1   :  { %s16_s14 = sshll.u32 %s356_s0, 4  ;;  %s17_s14 = int_to_ptr.vmem [resolvable:$true] %s16_s14 }
   0x2   :  { %9 = vsyncpa [#allocation5], 0  ;;  %s26_s17 = sshll.u32 %s357_s1, 4  ;;  %s219_s18 = scalar_lea.vmem %s17_s14, 64  ;;  %s27_s17 = int_to_ptr.vmem [resolvable:$true] %s26_s17 }
   0x3   :  { %p220_p0 = scmp.ne.s32.totalorder %s17_s14, %s219_s18  ;;  %p224_p1 = scmp.lt.s32.totalorder %s17_s14, %s17_s14 }
   0x4   :  { %p225_p2 = scmp.lt.s32.totalorder %s219_s18, %s219_s18 }
   0x6   :  { %p226_p3 = por %p225_p2, %p224_p1 }
   0x8   :  { %p227_p4 = pnand %p226_p3, %p220_p0 }
   0xa   :  { %230 = shalt.err (!%p227_p4)
}
   0xb   :  { %s247_s19 = smov [#allocation2]   ;;  %s231_s20 = scalar_lea.vmem %s27_s17, 16 }
   0xc   :  { %19 = dma.vmem_to_smem %s17_s14, 64, %s247_s19, [#allocation3]  }
   0xd   :  { %p232_p5 = scmp.ne.s32.totalorder %s27_s17, %s231_s20  ;;  %p236_p6 = scmp.lt.s32.totalorder %s27_s17, %s27_s17 }
   0xe   :  { %p237_p7 = scmp.lt.s32.totalorder %s231_s20, %s231_s20 }
  0x10   :  { %p238_p8 = por %p237_p7, %p236_p6 }
  0x12   :  { %p239_p9 = pnand %p238_p8, %p232_p5 }
  0x14   :  { %242 = shalt.err (!%p239_p9)
}
  0x15   :  { %s248_s0 = smov [#allocation4]  }
  0x16   :  { %29 = dma.vmem_to_smem %s27_s17, 16, %s248_s0, [#allocation5]  }
  0x17   :  { %243 = dma.done.wait [#allocation3], 64  }
  0x18   :  { %244 = vsyncadd [#allocation3], 4294967232 }
  0x19   :  { %245 = dma.done.wait [#allocation5], 16  }
  0x1a   :  { %246 = vsyncadd [#allocation5], 4294967280 }
  0x1b   :  { %38 = sfence }
  0x1c   :  { %s275_s1 = sld [smem:[#allocation4]]  ;;  %s184_s22 = sld [smem:[#allocation2 + $0x1]]  ;;  %v45_v0 = vld [vmem:[%s358_s2] sm:$0x3]  ;;  %v183_v1 = vld [vmem:[%s358_s2 + $0x2] sm:$0x3] }
  0x1d   :  { %s46_s21 = sld [smem:[#allocation2]]  ;;  %s280_s25 = sld [smem:[#allocation2 + $0x2]]  ;;  %v187_v2 = vld [vmem:[%s358_s2 + $0x4] sm:$0x3]  ;;  %v199_v3 = vld [vmem:[%s358_s2 + $0x8] sm:$0x3] }
  0x1e   :  { %s282_s26 = sld [smem:[#allocation2 + $0x3]]  ;;  %s287_s29 = sld [smem:[#allocation4 + $0x1]]  ;;  %v202_v4 = vld [vmem:[%s358_s2 + $0xa] sm:$0x3]  ;;  %v191_v7 = vld [vmem:[%s358_s2 + $0x6] sm:$0x3] }
  0x1f   :  { %s289_s30 = sld [smem:[#allocation2 + $0x80]]  ;;  %s294_s6 = sld [smem:[#allocation2 + $0x81]]  ;;  %v206_v35 = vld [vmem:[%s358_s2 + $0xc] sm:$0x3]  ;;  %v210_v36 = vld [vmem:[%s358_s2 + $0xe] sm:$0x3] }
  0x20   :  { %s296_s7 = sld [smem:[#allocation2 + $0x82]]  ;;  %s301_s10 = sld [smem:[#allocation2 + $0x83]] }
  0x21   :  { %s303_s11 = sld [smem:[#allocation4 + $0x2]]  ;;  %s312_s16 = sld [smem:[#allocation2 + $0x100]] }
  0x22   :  { %v40_v5 = vstv %s275_s1  ;;  %s314_s17 = sld [smem:[#allocation2 + $0x101]]  ;;  %v61_v9 = vstv %s184_s22  ;;  %s316_s18 = sld [smem:[#allocation2 + $0x102]] }
  0x23   :  { %v47_v6 = vstv %s46_s21  ;;  %s318_s19 = sld [smem:[#allocation2 + $0x103]]  ;;  %v62_v11 = vmul.f32 %v183_v1, %v61_v9  ;;  %v75_v12 = vstv %s280_s25  ;;  %v129_v14 = vmul.f32 %v202_v4, %v61_v9 }
  0x24   :  { %v48_v8 = vmul.f32 %v47_v6, %v45_v0  ;;  %v115_v10 = vmul.f32 %v199_v3, %v47_v6  ;;  %v89_v13 = vstv %s282_s26  ;;  %v76_v16 = vmul.f32 %v187_v2, %v75_v12 }
  0x25   :  { %v90_v17 = vmul.f32 %v191_v7, %v89_v13  ;;  %v42_v18 = vstv %s287_s29  ;;  %v51_v19 = vstv %s289_s30  ;;  %v65_v20 = vstv %s294_s6 }
  0x26   :  { %v49_v15 = vadd.f32 %v48_v8, %v40_v5  ;;  %v79_v21 = vstv %s296_s7  ;;  %v116_v22 = vadd.f32 %v115_v10, %v40_v5  ;;  %v52_v24 = vmul.f32 %v51_v19, %v45_v0 }
  0x27   :  { %v66_v25 = vmul.f32 %v183_v1, %v65_v20  ;;  %v80_v26 = vmul.f32 %v187_v2, %v79_v21  ;;  %v93_v27 = vstv %s301_s10  ;;  %v44_v28 = vstv %s303_s11 }
  0x28   :  { %v63_v23 = vadd.f32 %v62_v11, %v49_v15  ;;  %v55_v29 = vstv %s312_s16  ;;  %v69_v30 = vstv %s314_s17  ;;  %v53_v32 = vadd.f32 %v52_v24, %v42_v18 }
  0x29   :  { %v94_v33 = vmul.f32 %v191_v7, %v93_v27  ;;  %v56_v34 = vmul.f32 %v55_v29, %v45_v0  ;;  %v70_v37 = vmul.f32 %v183_v1, %v69_v30  ;;  %v83_v38 = vstv %s316_s18 }
  0x2a   :  { %v77_v31 = vadd.f32 %v76_v16, %v63_v23  ;;  %v97_v39 = vstv %s318_s19  ;;  %v130_v40 = vadd.f32 %v129_v14, %v116_v22  ;;  %v67_v42 = vadd.f32 %v66_v25, %v53_v32 }
  0x2b   :  { %v57_v43 = vadd.f32 %v56_v34, %v44_v28  ;;  %v84_v44 = vmul.f32 %v187_v2, %v83_v38  ;;  %v143_v45 = vmul.f32 %v206_v35, %v75_v12  ;;  %v157_v46 = vmul.f32 %v210_v36, %v89_v13 }
  0x2c   :  { %v91_v41 = vadd.f32 %v90_v17, %v77_v31  ;;  %v119_v47 = vmul.f32 %v199_v3, %v51_v19  ;;  %v81_v48 = vadd.f32 %v80_v26, %v67_v42  ;;  %v98_v50 = vmul.f32 %v191_v7, %v97_v39 }
  0x2d   :  { %v71_v49 = vadd.f32 %v70_v37, %v57_v43  ;;  %v133_v51 = vmul.f32 %v202_v4, %v65_v20  ;;  %v144_v52 = vadd.f32 %v143_v45, %v130_v40  ;;  %v147_v54 = vmul.f32 %v206_v35, %v79_v21 }
  0x2e   :  { %100 = vst [vmem:[%s359_s3] sm:$0x3] %v91_v41  ;;  %v120_v53 = vadd.f32 %v119_v47, %v42_v18  ;;  %v123_v55 = vmul.f32 %v199_v3, %v55_v29  ;;  %v95_v56 = vadd.f32 %v94_v33, %v81_v48  ;;  %v161_v58 = vmul.f32 %v210_v36, %v93_v27 }
  0x2f   :  { %v85_v57 = vadd.f32 %v84_v44, %v71_v49  ;;  %v137_v59 = vmul.f32 %v202_v4, %v69_v30  ;;  %v158_v60 = vadd.f32 %v157_v46, %v144_v52  ;;  %v151_v63 = vmul.f32 %v206_v35, %v83_v38 }
  0x30   :  { %v134_v61 = vadd.f32 %v133_v51, %v120_v53  ;;  %v124_v62 = vadd.f32 %v123_v55, %v44_v28  ;;  %195 = vst [vmem:[%s359_s3 + $0x2] sm:$0x3] %v95_v56  ;;  %v165_v3 = vmul.f32 %v210_v36, %v97_v39 }
  0x31   :  { %v99_v0 = vadd.f32 %v98_v50, %v85_v57  ;;  %214 = vst [vmem:[%s359_s3 + $0x6] sm:$0x3] %v158_v60 }
  0x32   :  { %v148_v1 = vadd.f32 %v147_v54, %v134_v61  ;;  %v138_v2 = vadd.f32 %v137_v59, %v124_v62 }
  0x33   :  { %196 = vst [vmem:[%s359_s3 + $0x4] sm:$0x3] %v99_v0 }
  0x34   :  { %v162_v4 = vadd.f32 %v161_v58, %v148_v1  ;;  %v152_v5 = vadd.f32 %v151_v63, %v138_v2 }
  0x36   :  { %215 = vst [vmem:[%s359_s3 + $0x8] sm:$0x3] %v162_v4  ;;  %v166_v6 = vadd.f32 %v165_v3, %v152_v5 }
  0x38   :  { %216 = vst [vmem:[%s359_s3 + $0xa] sm:$0x3] %v166_v6 }
  0x39   :  { %177 = vsyncpa [#allocation3], 1 }
  0x3a   :  { %178 = vsyncpa [#allocation5], 1 }

</bundles_post_ra>
